<compile_context>
chip_gen: v7x
topology: tpu7x:2x2x1
jax: 0.10.0
libtpu: 0.0.40
codegen_flags: <defaults>
</compile_context>

<pallas_src>
import math

import jax
import jax.numpy as jnp
import numpy as np
from jax.experimental import pallas as pl
from jax.experimental.pallas import tpu as pltpu

LOG_2PI = math.log(2.0 * math.pi)
_OUT_LANES = 128  # lane-dense output slab; lanes 0..3 carry the partial sums


def _grad_loss_kernel(logw_ref, xmask_ref, attn_ref, ymask_ref,
                      noise_ref, z_ref, mels_ref, muy_ref, out_ref):
    f32 = jnp.float32

    # ---- duration numerator: sum((logw - log(1e-8 + sum_k attn) * x_mask)^2)
    attn = attn_ref[...].astype(f32)                          # (Bt, T_text, T_mel)
    attn_sum = jnp.sum(attn, axis=-1)                         # (Bt, T_text)
    attn_sum = attn_sum.reshape(attn_sum.shape[0], 1, attn_sum.shape[-1])
    logw_hat = jnp.log(1e-8 + attn_sum) * xmask_ref[...].astype(f32)
    d = logw_ref[...].astype(f32) - logw_hat                  # (Bt, 1, T_text)
    dur_num = jnp.sum(d * d)

    # ---- sum(y_mask)
    ymask = ymask_ref[...].astype(f32)                        # (Bt, 1, T_mel)
    ymask_sum = jnp.sum(ymask)

    # ---- diffusion numerator: sum((noise_estimation + z)^2)
    nz = noise_ref[...].astype(f32) + z_ref[...].astype(f32)  # (Bt, F, T_mel)
    diff_num = jnp.sum(nz * nz)

    # ---- prior masked-square term: 0.5 * sum((melsout - mu_y)^2 * y_mask)
    #      (the constant 0.5*log(2*pi)*F*sum(y_mask) is added in the glue)
    pd = mels_ref[...].astype(f32) - muy_ref[...].astype(f32)  # (Bt, F, T_mel)
    prior_sq = 0.5 * jnp.sum(pd * pd * ymask)

    # ---- lane-dense per-step partial output: lanes 0..3, rest zero.
    lane = jax.lax.broadcasted_iota(jnp.int32, (1, 1, _OUT_LANES), 2)
    out_ref[...] = (jnp.where(lane == 0, dur_num, 0.0)
                    + jnp.where(lane == 1, ymask_sum, 0.0)
                    + jnp.where(lane == 2, diff_num, 0.0)
                    + jnp.where(lane == 3, prior_sq, 0.0)).astype(out_ref.dtype)


def _choose_block_batch(B, bytes_per_batch):
    """Pick how many batch elements to pack per grid step."""
    TARGET_BYTES = 4 << 20    # ~4 MB per step amortizes ~0.35 us step overhead
    VMEM_BUDGET = 20 << 20    # double-buffered input footprint cap (v7x-safe)
    bt = max(1, min(B, TARGET_BYTES // max(1, bytes_per_batch)))
    if B >= 2:
        bt = min(bt, B // 2)  # keep >=2 parallel steps so both v7x TCs get work
    while bt > 1 and 2 * bt * bytes_per_batch > VMEM_BUDGET:
        bt -= 1
    while B % bt != 0:        # avoid ragged last block
        bt -= 1
    return bt


def grad_loss_pallas(inputs, predictions, n_feats):
    (_speaker, _texts, text_lens, _max_text_len,
     _mels, _mel_lens, _max_mel_len) = inputs[2:]
    (_mu_x, logw, x_mask, y_mask, attn, mu_y, melsout,
     _encoder_outputs, noise_estimation, z) = predictions

    B = logw.shape[0]
    T_text = logw.shape[-1]
    F, T_mel = melsout.shape[1], melsout.shape[2]
    f32 = jnp.float32

    # Keep inputs in their native dtype (bf16 halves HBM bytes); cast in-kernel.
    big_inputs = (logw, x_mask, attn, y_mask, noise_estimation, z, melsout, mu_y)
    bytes_per_batch = sum(int(np.prod(a.shape[1:])) * a.dtype.itemsize
                          for a in big_inputs)

    bt = _choose_block_batch(B, bytes_per_batch)
    n_steps = B // bt

    def spec3(arr):
        # Bt batch elements per grid step; last two dims = full extents.
        return pl.BlockSpec((bt,) + arr.shape[1:], lambda b: (b, 0, 0))

    out_spec = pl.BlockSpec((1, 1, _OUT_LANES), lambda b: (b, 0, 0))

    # Advisory cost hint: memory-bound, a handful of flops per byte.
    flops = int(B * (2 * T_text * T_mel + 6 * F * T_mel + 4 * T_text + T_mel))
    bytes_accessed = int(sum(a.size * a.dtype.itemsize for a in big_inputs)
                         + n_steps * _OUT_LANES * 4)
    cost = pl.CostEstimate(flops=flops,
                           transcendentals=int(B * T_text),
                           bytes_accessed=bytes_accessed)

    partials = pl.pallas_call(
        _grad_loss_kernel,
        out_shape=jax.ShapeDtypeStruct((n_steps, 1, _OUT_LANES), f32),
        grid_spec=pltpu.PrefetchScalarGridSpec(
            num_scalar_prefetch=0,
            grid=(n_steps,),
            in_specs=[spec3(a) for a in big_inputs],
            out_specs=out_spec,
        ),
        compiler_params=pltpu.CompilerParams(
            dimension_semantics=("parallel",),
            # Raise v5e's 16 MiB default scoped limit; still well under v7x's
            # 64 MiB physical VMEM given the <=20 MiB footprint cap above.
            vmem_limit_bytes=32 << 20),
        cost_estimate=cost,
    )(*big_inputs)

    totals = jnp.sum(partials[:, 0, :], axis=0)     # (128,)
    dur_num = totals[0]
    ymask_sum = totals[1]
    diff_num = totals[2]
    prior_sq = totals[3]

    text_sum = jnp.sum(text_lens).astype(f32)
    denom = ymask_sum * jnp.asarray(n_feats, f32)

    dur_loss = dur_num / text_sum
    diff_loss = diff_num / denom
    prior_loss = (prior_sq + 0.5 * LOG_2PI * n_feats * ymask_sum) / denom
    total_loss = dur_loss + prior_loss + diff_loss
    return total_loss, dur_loss, prior_loss, diff_loss


def grad_loss_ref(inputs, predictions, n_feats):
    """Pure-JAX reference mirroring the PyTorch forward exactly."""
    (_speaker, _texts, text_lens, _max_text_len,
     _mels, _mel_lens, _max_mel_len) = inputs[2:]
    (_mu_x, logw, x_mask, y_mask, attn, mu_y, melsout,
     _encoder_outputs, noise_estimation, z) = predictions
    logw_hat = jnp.log(1e-8 + jnp.sum(attn[:, None, :, :], axis=-1)) * x_mask
    dur_loss = jnp.sum((logw - logw_hat) ** 2) / jnp.sum(text_lens)
    diff_loss = jnp.sum((noise_estimation + z) ** 2) / (jnp.sum(y_mask) * n_feats)
    prior_loss = jnp.sum(0.5 * ((melsout - mu_y) ** 2 + LOG_2PI) * y_mask)
    prior_loss = prior_loss / (jnp.sum(y_mask) * n_feats)
    total_loss = dur_loss + prior_loss + diff_loss
    return total_loss, dur_loss, prior_loss, diff_loss


if __name__ == "__main__":
    # Small synthetic shapes consistent with the forward pass.
    B, T_TEXT, T_MEL, N_FEATS = 2, 16, 32, 8

    key = jax.random.PRNGKey(0)
    keys = jax.random.split(key, 8)

    text_lens = jnp.array([16, 12], dtype=jnp.int32)
    mel_lens = jnp.array([32, 24], dtype=jnp.int32)

    x_mask = (jnp.arange(T_TEXT)[None, :] < text_lens[:, None]).astype(jnp.float32)[:, None, :]
    y_mask = (jnp.arange(T_MEL)[None, :] < mel_lens[:, None]).astype(jnp.float32)[:, None, :]

    attn = jnp.abs(jax.random.normal(keys[0], (B, T_TEXT, T_MEL), jnp.float32))
    logw = jax.random.normal(keys[1], (B, 1, T_TEXT), jnp.float32) * x_mask
    mu_y = jax.random.normal(keys[2], (B, N_FEATS, T_MEL), jnp.float32)
    melsout = jax.random.normal(keys[3], (B, N_FEATS, T_MEL), jnp.float32)
    noise_estimation = jax.random.normal(keys[4], (B, N_FEATS, T_MEL), jnp.float32)
    z = jax.random.normal(keys[5], (B, N_FEATS, T_MEL), jnp.float32)
    mu_x = jax.random.normal(keys[6], (B, N_FEATS, T_TEXT), jnp.float32)       # unused
    encoder_outputs = jax.random.normal(keys[7], (B, N_FEATS, T_TEXT), jnp.float32)  # unused

    speaker = jnp.zeros((B,), jnp.int32)
    texts = jnp.zeros((B, T_TEXT), jnp.int32)
    mels = jnp.zeros((B, N_FEATS, T_MEL), jnp.float32)

    inputs = (None, None, speaker, texts, text_lens, T_TEXT, mels, mel_lens, T_MEL)
    predictions = (mu_x, logw, x_mask, y_mask, attn, mu_y, melsout,
                   encoder_outputs, noise_estimation, z)

    out = grad_loss_pallas(inputs, predictions, N_FEATS)
    out = jax.block_until_ready(out)

    ref = grad_loss_ref(inputs, predictions, N_FEATS)
    np.testing.assert_allclose(np.array(out), np.array(ref), rtol=1e-5, atol=1e-6)

    print("KERNEL_OK")
</pallas_src>

<mosaic_0001>
module attributes {stable_mosaic.version = 11 : i64} {
  func.func @_grad_loss_kernel(%arg0: i32, %arg1: memref<1x1x16xf32, #tpu.memory_space<vmem>>, %arg2: memref<1x1x16xf32, #tpu.memory_space<vmem>>, %arg3: memref<1x16x32xf32, #tpu.memory_space<vmem>>, %arg4: memref<1x1x32xf32, #tpu.memory_space<vmem>>, %arg5: memref<1x8x32xf32, #tpu.memory_space<vmem>>, %arg6: memref<1x8x32xf32, #tpu.memory_space<vmem>>, %arg7: memref<1x8x32xf32, #tpu.memory_space<vmem>>, %arg8: memref<1x8x32xf32, #tpu.memory_space<vmem>>, %arg9: memref<1x1x128xf32, #tpu.memory_space<vmem>>) attributes {dimension_semantics = [#tpu.dimension_semantics<parallel>], iteration_bounds = array<i64: 2>, scalar_prefetch = 0 : i64, scratch_operands = 0 : i64, tpu.core_type = #tpu.core_type<tc>, window_params = [{transform_indices = @transform_0, window_bounds = array<i64: 1, 1, 16>}, {transform_indices = @transform_1, window_bounds = array<i64: 1, 1, 16>}, {transform_indices = @transform_2, window_bounds = array<i64: 1, 16, 32>}, {transform_indices = @transform_3, window_bounds = array<i64: 1, 1, 32>}, {transform_indices = @transform_4, window_bounds = array<i64: 1, 8, 32>}, {transform_indices = @transform_5, window_bounds = array<i64: 1, 8, 32>}, {transform_indices = @transform_6, window_bounds = array<i64: 1, 8, 32>}, {transform_indices = @transform_7, window_bounds = array<i64: 1, 8, 32>}, {transform_indices = @transform_8, window_bounds = array<i64: 1, 1, 128>}]} {
    %c0 = arith.constant 0 : index
    %c0_0 = arith.constant 0 : index
    %c0_1 = arith.constant 0 : index
    %0 = vector.load %arg3[%c0, %c0_0, %c0_1] : memref<1x16x32xf32, #tpu.memory_space<vmem>>, vector<1x16x32xf32>
    %cst = arith.constant dense<0.000000e+00> : vector<1x16xf32>
    %1 = vector.multi_reduction <add>, %0, %cst [2] : vector<1x16x32xf32> to vector<1x16xf32>
    %2 = vector.shape_cast %1 : vector<1x16xf32> to vector<1x1x16xf32>
    %cst_2 = arith.constant 9.99999993E-9 : f32
    %3 = vector.broadcast %cst_2 : f32 to vector<1x1x16xf32>
    %4 = arith.addf %3, %2 : vector<1x1x16xf32>
    %5 = math.log %4 : vector<1x1x16xf32>
    %c0_3 = arith.constant 0 : index
    %c0_4 = arith.constant 0 : index
    %c0_5 = arith.constant 0 : index
    %6 = vector.load %arg2[%c0_3, %c0_4, %c0_5] : memref<1x1x16xf32, #tpu.memory_space<vmem>>, vector<1x1x16xf32>
    %7 = arith.mulf %5, %6 : vector<1x1x16xf32>
    %c0_6 = arith.constant 0 : index
    %c0_7 = arith.constant 0 : index
    %c0_8 = arith.constant 0 : index
    %8 = vector.load %arg1[%c0_6, %c0_7, %c0_8] : memref<1x1x16xf32, #tpu.memory_space<vmem>>, vector<1x1x16xf32>
    %9 = arith.subf %8, %7 : vector<1x1x16xf32>
    %10 = arith.mulf %9, %9 : vector<1x1x16xf32>
    %11 = vector.shape_cast %10 : vector<1x1x16xf32> to vector<1x1x1x16xf32>
    %cst_9 = arith.constant dense<0.000000e+00> : vector<1xf32>
    %12 = vector.multi_reduction <add>, %11, %cst_9 [1, 2, 3] : vector<1x1x1x16xf32> to vector<1xf32>
    %13 = vector.shape_cast %12 : vector<1xf32> to vector<1x1x1x1xf32>
    %14 = vector.extract %13[0, 0, 0, 0] : f32 from vector<1x1x1x1xf32>
    %c0_10 = arith.constant 0 : index
    %c0_11 = arith.constant 0 : index
    %c0_12 = arith.constant 0 : index
    %15 = vector.load %arg4[%c0_10, %c0_11, %c0_12] : memref<1x1x32xf32, #tpu.memory_space<vmem>>, vector<1x1x32xf32>
    %16 = vector.shape_cast %15 : vector<1x1x32xf32> to vector<1x1x1x32xf32>
    %cst_13 = arith.constant dense<0.000000e+00> : vector<1xf32>
    %17 = vector.multi_reduction <add>, %16, %cst_13 [1, 2, 3] : vector<1x1x1x32xf32> to vector<1xf32>
    %18 = vector.shape_cast %17 : vector<1xf32> to vector<1x1x1x1xf32>
    %19 = vector.extract %18[0, 0, 0, 0] : f32 from vector<1x1x1x1xf32>
    %c0_14 = arith.constant 0 : index
    %c0_15 = arith.constant 0 : index
    %c0_16 = arith.constant 0 : index
    %20 = vector.load %arg5[%c0_14, %c0_15, %c0_16] : memref<1x8x32xf32, #tpu.memory_space<vmem>>, vector<1x8x32xf32>
    %c0_17 = arith.constant 0 : index
    %c0_18 = arith.constant 0 : index
    %c0_19 = arith.constant 0 : index
    %21 = vector.load %arg6[%c0_17, %c0_18, %c0_19] : memref<1x8x32xf32, #tpu.memory_space<vmem>>, vector<1x8x32xf32>
    %22 = arith.addf %20, %21 : vector<1x8x32xf32>
    %23 = arith.mulf %22, %22 : vector<1x8x32xf32>
    %24 = vector.shape_cast %23 : vector<1x8x32xf32> to vector<1x1x8x32xf32>
    %cst_20 = arith.constant dense<0.000000e+00> : vector<1xf32>
    %25 = vector.multi_reduction <add>, %24, %cst_20 [1, 2, 3] : vector<1x1x8x32xf32> to vector<1xf32>
    %26 = vector.shape_cast %25 : vector<1xf32> to vector<1x1x1x1xf32>
    %27 = vector.extract %26[0, 0, 0, 0] : f32 from vector<1x1x1x1xf32>
    %c0_21 = arith.constant 0 : index
    %c0_22 = arith.constant 0 : index
    %c0_23 = arith.constant 0 : index
    %28 = vector.load %arg7[%c0_21, %c0_22, %c0_23] : memref<1x8x32xf32, #tpu.memory_space<vmem>>, vector<1x8x32xf32>
    %c0_24 = arith.constant 0 : index
    %c0_25 = arith.constant 0 : index
    %c0_26 = arith.constant 0 : index
    %29 = vector.load %arg8[%c0_24, %c0_25, %c0_26] : memref<1x8x32xf32, #tpu.memory_space<vmem>>, vector<1x8x32xf32>
    %30 = arith.subf %28, %29 : vector<1x8x32xf32>
    %31 = arith.mulf %30, %30 : vector<1x8x32xf32>
    %32 = vector.broadcast %15 : vector<1x1x32xf32> to vector<1x8x32xf32>
    %33 = arith.mulf %31, %32 : vector<1x8x32xf32>
    %34 = vector.shape_cast %33 : vector<1x8x32xf32> to vector<1x1x8x32xf32>
    %cst_27 = arith.constant dense<0.000000e+00> : vector<1xf32>
    %35 = vector.multi_reduction <add>, %34, %cst_27 [1, 2, 3] : vector<1x1x8x32xf32> to vector<1xf32>
    %36 = vector.shape_cast %35 : vector<1xf32> to vector<1x1x1x1xf32>
    %37 = vector.extract %36[0, 0, 0, 0] : f32 from vector<1x1x1x1xf32>
    %cst_28 = arith.constant 5.000000e-01 : f32
    %38 = arith.mulf %cst_28, %37 : f32
    %39 = tpu.iota {dimensions = array<i32: 2>} : vector<1x1x128xi32>
    %c0_i32 = arith.constant 0 : i32
    %40 = vector.broadcast %c0_i32 : i32 to vector<1x1x128xi32>
    %41 = arith.cmpi eq, %39, %40 : vector<1x1x128xi32>
    %cst_29 = arith.constant 0.000000e+00 : f32
    %42 = vector.broadcast %14 : f32 to vector<1x1x128xf32>
    %43 = vector.broadcast %cst_29 : f32 to vector<1x1x128xf32>
    %44 = arith.select %41, %42, %43 : vector<1x1x128xi1>, vector<1x1x128xf32>
    %c1_i32 = arith.constant 1 : i32
    %45 = vector.broadcast %c1_i32 : i32 to vector<1x1x128xi32>
    %46 = arith.cmpi eq, %39, %45 : vector<1x1x128xi32>
    %cst_30 = arith.constant 0.000000e+00 : f32
    %47 = vector.broadcast %19 : f32 to vector<1x1x128xf32>
    %48 = vector.broadcast %cst_30 : f32 to vector<1x1x128xf32>
    %49 = arith.select %46, %47, %48 : vector<1x1x128xi1>, vector<1x1x128xf32>
    %50 = arith.addf %44, %49 : vector<1x1x128xf32>
    %c2_i32 = arith.constant 2 : i32
    %51 = vector.broadcast %c2_i32 : i32 to vector<1x1x128xi32>
    %52 = arith.cmpi eq, %39, %51 : vector<1x1x128xi32>
    %cst_31 = arith.constant 0.000000e+00 : f32
    %53 = vector.broadcast %27 : f32 to vector<1x1x128xf32>
    %54 = vector.broadcast %cst_31 : f32 to vector<1x1x128xf32>
    %55 = arith.select %52, %53, %54 : vector<1x1x128xi1>, vector<1x1x128xf32>
    %56 = arith.addf %50, %55 : vector<1x1x128xf32>
    %c3_i32 = arith.constant 3 : i32
    %57 = vector.broadcast %c3_i32 : i32 to vector<1x1x128xi32>
    %58 = arith.cmpi eq, %39, %57 : vector<1x1x128xi32>
    %cst_32 = arith.constant 0.000000e+00 : f32
    %59 = vector.broadcast %38 : f32 to vector<1x1x128xf32>
    %60 = vector.broadcast %cst_32 : f32 to vector<1x1x128xf32>
    %61 = arith.select %58, %59, %60 : vector<1x1x128xi1>, vector<1x1x128xf32>
    %62 = arith.addf %56, %61 : vector<1x1x128xf32>
    %c0_33 = arith.constant 0 : index
    %c0_34 = arith.constant 0 : index
    %c0_35 = arith.constant 0 : index
    %63 = vector.load %arg9[%c0_33, %c0_34, %c0_35] : memref<1x1x128xf32, #tpu.memory_space<vmem>>, vector<1x1x128xf32>
    tpu.vector_store %arg9[%c0_33, %c0_34, %c0_35], %62 {strides = array<i32>} : memref<1x1x128xf32, #tpu.memory_space<vmem>>, vector<1x1x128xf32>,
    return
  }
  func.func @transform_0(%arg0: i32) -> (i32, i32, i32) {
    %c0_i32 = arith.constant 0 : i32
    %c0_i32_0 = arith.constant 0 : i32
    %c0_i32_1 = arith.constant 0 : i32
    return %arg0, %c0_i32, %c0_i32_0 : i32, i32, i32
  }
  func.func @transform_1(%arg0: i32) -> (i32, i32, i32) {
    %c0_i32 = arith.constant 0 : i32
    %c0_i32_0 = arith.constant 0 : i32
    %c0_i32_1 = arith.constant 0 : i32
    return %arg0, %c0_i32, %c0_i32_0 : i32, i32, i32
  }
  func.func @transform_2(%arg0: i32) -> (i32, i32, i32) {
    %c0_i32 = arith.constant 0 : i32
    %c0_i32_0 = arith.constant 0 : i32
    %c0_i32_1 = arith.constant 0 : i32
    return %arg0, %c0_i32, %c0_i32_0 : i32, i32, i32
  }
  func.func @transform_3(%arg0: i32) -> (i32, i32, i32) {
    %c0_i32 = arith.constant 0 : i32
    %c0_i32_0 = arith.constant 0 : i32
    %c0_i32_1 = arith.constant 0 : i32
    return %arg0, %c0_i32, %c0_i32_0 : i32, i32, i32
  }
  func.func @transform_4(%arg0: i32) -> (i32, i32, i32) {
    %c0_i32 = arith.constant 0 : i32
    %c0_i32_0 = arith.constant 0 : i32
    %c0_i32_1 = arith.constant 0 : i32
    return %arg0, %c0_i32, %c0_i32_0 : i32, i32, i32
  }
  func.func @transform_5(%arg0: i32) -> (i32, i32, i32) {
    %c0_i32 = arith.constant 0 : i32
    %c0_i32_0 = arith.constant 0 : i32
    %c0_i32_1 = arith.constant 0 : i32
    return %arg0, %c0_i32, %c0_i32_0 : i32, i32, i32
  }
  func.func @transform_6(%arg0: i32) -> (i32, i32, i32) {
    %c0_i32 = arith.constant 0 : i32
    %c0_i32_0 = arith.constant 0 : i32
    %c0_i32_1 = arith.constant 0 : i32
    return %arg0, %c0_i32, %c0_i32_0 : i32, i32, i32
  }
  func.func @transform_7(%arg0: i32) -> (i32, i32, i32) {
    %c0_i32 = arith.constant 0 : i32
    %c0_i32_0 = arith.constant 0 : i32
    %c0_i32_1 = arith.constant 0 : i32
    return %arg0, %c0_i32, %c0_i32_0 : i32, i32, i32
  }
  func.func @transform_8(%arg0: i32) -> (i32, i32, i32) {
    %c0_i32 = arith.constant 0 : i32
    %c0_i32_0 = arith.constant 0 : i32
    %c0_i32_1 = arith.constant 0 : i32
    return %arg0, %c0_i32, %c0_i32_0 : i32, i32, i32
  }
}

</mosaic_0001>

<bundles_post_ra>
// kernel: tpu_custom_call.1
= control target key start
LH: loop header
LB: loop body
LE: loop exit
PB: predicated region body
PF: predicated region fallthrough
CT: control target
= control target key end

     0   :  { %s1915_s0 = inlined_call_operand.hbm [shape: f32[2,1,16], index: 0, kind: input, shape index: {}]   ;;  %s1916_s1 = inlined_call_operand.vmem [shape: f32[2,1,16], index: 1, kind: input, shape index: {}]   ;;  %s1917_s2 = inlined_call_operand.hbm [shape: f32[2,16,32], index: 2, kind: input, shape index: {}]   ;;  %s1918_s3 = inlined_call_operand.hbm [shape: f32[2,1,32], index: 3, kind: input, shape index: {}]   ;;  %s1919_s4 = inlined_call_operand.hbm [shape: f32[2,8,32], index: 4, kind: input, shape index: {}]   ;;  %s1920_s5 = inlined_call_operand.vmem [shape: f32[2,8,32], index: 5, kind: input, shape index: {}]   ;;  %s1921_s6 = inlined_call_operand.hbm [shape: f32[2,8,32], index: 6, kind: input, shape index: {}]   ;;  %s1922_s7 = inlined_call_operand.hbm [shape: f32[2,8,32], index: 7, kind: input, shape index: {}]   ;;  %s1923_s8 = inlined_call_operand.hbm [shape: f32[2,1,128], index: 8, kind: output, shape index: {}]  }
   0x1   :  { %1939 = sst [smem:[#allocation26_spill]] %s1917_s2 }
   0x2   :  { %1940 = sst [smem:[#allocation27_spill]] %s1919_s4 }
   0x3   :  { %1941 = sst [smem:[#allocation28_spill]] %s1923_s8 }
   0x4   :  { %13 = vsyncpa [#allocation3], 0 }
   0x5   :  { %15 = vsyncpa [#allocation3 + $0x1], 0 }
   0x6   :  { %16 = vsyncpa [#allocation6], 0 }
   0x7   :  { %18 = vsyncpa [#allocation6 + $0x1], 0 }
   0x8   :  { %19 = vsyncpa [#allocation9], 0 }
   0x9   :  { %21 = vsyncpa [#allocation9 + $0x1], 0 }
   0xa   :  { %22 = vsyncpa [#allocation12], 0 }
   0xb   :  { %24 = vsyncpa [#allocation12 + $0x1], 0 }
   0xc   :  { %25 = vsyncpa [#allocation4], 0 }
   0xd   :  { %27 = vsyncpa [#allocation4 + $0x1], 0  ;;  %s1506_s27 = smov 0   ;;  %s1508_s28 = smov 0  }
   0xe   :  { %s1510_s29 = smov 0   ;;  %s1512_s30 = smov 0  }
   0xf LB: > { %1942 = sst [smem:[#allocation19_spill]] %s1436_s27  ;;  %s1527_s9 = sadd.s32 4294967295, %s1448_s30   ;;  %s1448_s30 = sphi %s1512_s30, %s1973_s30   ;;  %s1444_s29 = sphi %s1510_s29, %s1975_s29   ;;  %s1440_s28 = sphi %s1508_s28, %s1977_s28   ;;  %s1436_s27 = sphi %s1506_s27, %s1976_s27  }
  0x10   : > { %1943 = sst [smem:[#allocation20_spill]] %s1444_s29  ;;  %s1072_s10 = sadd.s32 4294967294, %s1448_s30  }
  0x11   : > { %1944 = sst [smem:[#allocation21_spill]] %s1448_s30  ;;  %s1531_s11 = sadd.s32 1, %s1448_s30  }
  0x12   : > { %1945 = sst [smem:[#allocation22_spill]] %s1531_s11  ;;  %s40_s12 = sadd.s32 1, %s1444_s29 }
  0x13   : > { %s37_s13 = ssub.s32 %s1448_s30, %s1531_s11  ;;  %p47_p0 = scmp.ne.s32.totalorder %s1444_s29, %s1440_s28 }
  0x14   : > { %p38_p1 = scmp.eq.s32.totalorder %s37_s13, 0  ;;  %p48_p2 = scmp.eq.s32.totalorder %s1448_s30, 0 }
  0x15   : > { %p53_p3 = scmp.ne.s32.totalorder %s1440_s28, %s1436_s27  ;;  %p54_p4 = scmp.eq.s32.totalorder %s1527_s9, 0 }
  0x16   : > { %s1543_s14 = scalar_select %p38_p1, %s1444_s29, %s40_s12  }
  0x17   : > { %p49_p5 = por %p48_p2, %p47_p0  ;;  %p1545_p6 = por %p54_p4, %p53_p3 }
  0x18   : > { %1946 = sst [smem:[#allocation23_spill]] %s1543_s14  ;;  %p259_p7 = scmp.eq.s32.totalorder %s1527_s9, 1 }
  0x19   : > { %s1947_s15 = scalar_select %p1545_p6, 1, 0 }
  0x1a   : > { %p265_p8 = scmp.eq.s32.totalorder %s1072_s10, 1  ;;  %p1146_p10 = scmp.lt.s32.totalorder %s1448_s30, 2 }
  0x1b   : > { %p1552_p11 = por %p259_p7, %p47_p0  ;;  %s1561_s18 = sand.u32 1, %s1444_s29  }
  0x1c   : > { %p1556_p12 = por %p265_p8, %p53_p3  ;;  %p1563_p13 = pnand %p1146_p10, %p49_p5 }
  0x1d   : > { %s1948_s16 = scalar_select %p1552_p11, 1, 0 }
  0x1e   : > { %s1950_s17 = scalar_select %p1556_p12, 1, 0 }
  0x1f   : > { %1949 = sst [smem:[#allocation24_spill]] %s1948_s16  ;;  %s1924_s20 = sand.u32 1, %s1448_s30  }
  0x20   : > { %1951 = sst [smem:[#allocation25_spill]] %s1950_s17  ;;  %s1076_s21 = sshll.u32 %s1561_s18, 4 }
  0x21   : > { %s1952_s19 = scalar_select %p1563_p13, 1, 0 }
  0x22   : > { %s1100_s22 = sshll.u32 %s1448_s30, 8  ;;  %s1953_s2 = sld [smem:[#allocation26_spill]] }
  0x23   : > { %s312_s26 = scalar_lea.vmem [#allocation5], %s1076_s21  ;;  %s1580_s12 = scalar_lea.sflag [#allocation6], %s1924_s20 }
  0x24   : > { %s319_s10 = sshll.u32 %s312_s26, 4  ;;  %p1586_p2 = pneg %p1563_p13  ;;  %s1575_s10 = int_to_ptr.vmem [resolvable:$true] %s319_s10 }
  0x28   : > { %s1573_s25 = scalar_lea.hbm %s1953_s2, %s1100_s22  ;;  %s1195_s23 = scalar_lea.hbm %s1953_s2, 512 }
  0x29   : > { %s1190_s13 = scalar_lea.hbm %s1573_s25, 256  ;;  %p1196_p5 = scmp.lt.u32.totalorder %s1573_s25, %s1953_s2 }
  0x2a   : > { %p1191_p1 = scmp.ne.s32.totalorder %s1573_s25, %s1190_s13  ;;  %p1197_p7 = scmp.lt.u32.totalorder %s1195_s23, %s1190_s13 }
  0x2b   : > { %p1199_p10 = scmp.lt.u32.totalorder %s1190_s13, %s1573_s25 }
  0x2c   : > { %p1193_p3 = pnand %p1586_p2, %p1191_p1  ;;  %p1198_p8 = por %p1197_p7, %p1196_p5 }
  0x2e   : > { %p1194_p4 = pneg %p1193_p3  ;;  %p1200_p9 = por %p1199_p10, %p1198_p8 }
  0x30   : > { %p1201_p0 = pnand %p1200_p9, %p1194_p4 }
  0x32   : > { %1204 = shalt.err (!%p1201_p0)
}
  0x33   : > { %s1205_s20 = scalar_lea.vmem %s1575_s10, 256  ;;  %s1450_s22 = smov [#allocation5]  }
  0x34   : > { %p1206_p1 = scmp.ne.s32.totalorder %s1575_s10, %s1205_s20  ;;  %s1210_s21 = sshll.u32 %s1450_s22, 4  ;;  %s1211_s21 = int_to_ptr.vmem [resolvable:$false] %s1210_s21 }
  0x35   : > { %s1212_s24 = scalar_lea.vmem %s1211_s21, 512  ;;  %p1213_p11 = scmp.lt.s32.totalorder %s1575_s10, %s1211_s21 }
  0x36   : > { %p1208_p3 = pnand %p1206_p1, %p1586_p2  ;;  %p1214_p6 = scmp.lt.s32.totalorder %s1212_s24, %s1205_s20 }
  0x38   : > { %p1209_p12 = pneg %p1208_p3  ;;  %p1215_p5 = por %p1214_p6, %p1213_p11 }
  0x3a   : > { %p1216_p7 = pnand %p1215_p5, %p1209_p12 }
  0x3c   : > { %1219 = shalt.err (!%p1216_p7)
}
  0x3d   : > { %s1451_s13 = smov 128   ;;  %s1452_s23 = smov 8  }
  0x3e   : > { %1129 = dma.hbm_to_vmem [thread:$0]  (!%p1563_p13), %s1573_s25, 256, %s1575_s10, %s1580_s12, %s1451_s13, %s1451_s13, %s1452_s23  }
  0x3f   : > { %p405_p9 = scmp.lt.s32.totalorder %s1448_s30, 3  ;;  %s1612_s26 = sshll.u32 %s1561_s18, 3 }
  0x40   : > { %s1615_s20 = sshll.u32 %s1448_s30, 7  ;;  %p1955_p6 = scmp.ge.s32.totalorder %s1448_s30, 1 }
  0x41   : > { %s1957_s4 = sld [smem:[#allocation27_spill]]  ;;  %s350_s25 = scalar_lea.vmem [#allocation8], %s1612_s26 }
  0x42   : > { %p1619_p11 = pnand %p1955_p6, %p405_p9  ;;  %s357_s10 = sshll.u32 %s350_s25, 4  ;;  %s358_s10 = int_to_ptr.vmem [resolvable:$true] %s357_s10 }
  0x43   : > { %s1958_s13 = sand.u32 1, %s1448_s30  }
  0x44   : > { %s1956_s22 = scalar_select %p1619_p11, 1, 0 }
  0x45   : > { %s1632_s23 = scalar_lea.sflag [#allocation9], %s1958_s13 }
  0x47   : > { %s1627_s2 = scalar_lea.hbm %s1957_s4, %s1615_s20  ;;  %s1225_s21 = scalar_lea.hbm %s1957_s4, 256 }
  0x48   : > { %s1220_s29 = scalar_lea.hbm %s1627_s2, 128  ;;  %p1226_p8 = scmp.lt.u32.totalorder %s1627_s2, %s1957_s4 }
  0x49   : > { %p1221_p12 = scmp.ne.s32.totalorder %s1627_s2, %s1220_s29  ;;  %p1227_p10 = scmp.lt.u32.totalorder %s1225_s21, %s1220_s29 }
  0x4a   : > { %p1229_p3 = scmp.lt.u32.totalorder %s1220_s29, %s1627_s2 }
  0x4b   : > { %p1223_p0 = pnand %p1221_p12, %p1586_p2  ;;  %p1228_p1 = por %p1227_p10, %p1226_p8 }
  0x4d   : > { %p1224_p4 = pneg %p1223_p0  ;;  %p1230_p5 = por %p1229_p3, %p1228_p1 }
  0x4f   : > { %p1231_p7 = pnand %p1230_p5, %p1224_p4 }
  0x51   : > { %1234 = shalt.err (!%p1231_p7)
}
  0x52   : > { %s1235_s25 = scalar_lea.vmem %s358_s10, 128  ;;  %s1453_s13 = smov [#allocation8]  }
  0x53   : > { %p1236_p9 = scmp.ne.s32.totalorder %s358_s10, %s1235_s25  ;;  %s1240_s8 = sshll.u32 %s1453_s13, 4  ;;  %s1241_s8 = int_to_ptr.vmem [resolvable:$false] %s1240_s8 }
  0x54   : > { %s1242_s11 = scalar_lea.vmem %s1241_s8, 256  ;;  %p1243_p0 = scmp.lt.s32.totalorder %s358_s10, %s1241_s8 }
  0x55   : > { %p1238_p6 = pnand %p1236_p9, %p1586_p2  ;;  %p1244_p11 = scmp.lt.s32.totalorder %s1242_s11, %s1235_s25 }
  0x57   : > { %p1239_p12 = pneg %p1238_p6  ;;  %p1245_p13 = por %p1244_p11, %p1243_p0 }
  0x59   : > { %p1246_p8 = pnand %p1245_p13, %p1239_p12 }
  0x5b   : > { %1249 = shalt.err (!%p1246_p8)
}
  0x5c   : > { %p1959_p10 = scmp.ne.s32.totalorder %s1952_s19, 0  ;;  %s1075_s27 = sshll.u32 %s1448_s30, 4 }
  0x5d   : > { %s1656_s21 = scalar_lea.hbm %s1915_s0, %s1075_s27  ;;  %s288_s8 = scalar_lea.vmem [#allocation2], %s1561_s18 }
  0x5e   : > { %1135 = dma.hbm_to_vmem [thread:$0]  (!%p1959_p10), %s1627_s2, 128, %s358_s10, %s1632_s23  }
  0x5f   : > { %s295_s24 = sshll.u32 %s288_s8, 4  ;;  %s1664_s11 = scalar_lea.hbm %s1918_s3, %s1075_s27  ;;  %s1659_s24 = int_to_ptr.vmem [resolvable:$true] %s295_s24 }
  0x60   : > { %s286_s2 = scalar_lea.sflag [#allocation3], %s1561_s18  ;;  %s1250_s10 = scalar_lea.hbm %s1656_s21, 16 }
  0x61   : > { %p1251_p13 = scmp.ne.s32.totalorder %s1656_s21, %s1250_s10  ;;  %s1255_s4 = scalar_lea.hbm %s1915_s0, 32 }
  0x62   : > { %p1256_p1 = scmp.lt.u32.totalorder %s1656_s21, %s1915_s0  ;;  %p1257_p3 = scmp.lt.u32.totalorder %s1255_s4, %s1250_s10 }
  0x63   : > { %p1253_p11 = pnand %p1251_p13, %p1586_p2  ;;  %p1259_p7 = scmp.lt.u32.totalorder %s1250_s10, %s1656_s21 }
  0x64   : > { %p1258_p5 = por %p1257_p3, %p1256_p1 }
  0x65   : > { %p1254_p4 = pneg %p1253_p11 }
  0x66   : > { %p1260_p9 = por %p1259_p7, %p1258_p5 }
  0x68   : > { %p1261_p6 = pnand %p1260_p9, %p1254_p4 }
  0x6a   : > { %1264 = shalt.err (!%p1261_p6)
}
  0x6b   : > { %s1265_s27 = scalar_lea.vmem %s1659_s24, 16  ;;  %s1454_s8 = smov [#allocation2]  }
  0x6c   : > { %p1266_p12 = scmp.ne.s32.totalorder %s1659_s24, %s1265_s27  ;;  %s1270_s25 = sshll.u32 %s1454_s8, 4  ;;  %s1271_s25 = int_to_ptr.vmem [resolvable:$false] %s1270_s25 }
  0x6d   : > { %s1272_s30 = scalar_lea.vmem %s1271_s25, 32  ;;  %p1273_p13 = scmp.lt.s32.totalorder %s1659_s24, %s1271_s25 }
  0x6e   : > { %p1268_p0 = pnand %p1266_p12, %p1586_p2  ;;  %p1274_p11 = scmp.lt.s32.totalorder %s1272_s30, %s1265_s27 }
  0x70   : > { %p1269_p8 = pneg %p1268_p0  ;;  %p1275_p1 = por %p1274_p11, %p1273_p13 }
  0x72   : > { %p1276_p3 = pnand %p1275_p1, %p1269_p8 }
  0x74   : > { %1279 = shalt.err (!%p1276_p3)
}
  0x75   : > { %1126 = dma.hbm_to_vmem [thread:$0]  (!%p1959_p10), %s1656_s21, 16, %s1659_s24, %s286_s2  }
  0x76   : > { %s332_s4 = scalar_lea.vmem [#allocation7], %s1561_s18  ;;  %s1693_s29 = scalar_lea.hbm %s1921_s6, %s1615_s20 }
  0x77   : > { %s339_s16 = sshll.u32 %s332_s4, 4  ;;  %s375_s17 = scalar_lea.vmem [#allocation10], %s1612_s26  ;;  %s1695_s16 = int_to_ptr.vmem [resolvable:$true] %s339_s16 }
  0x78   : > { %s382_s27 = sshll.u32 %s375_s17, 4  ;;  %s1280_s8 = scalar_lea.hbm %s1664_s11, 16  ;;  %s383_s27 = int_to_ptr.vmem [resolvable:$true] %s382_s27 }
  0x79   : > { %p1281_p4 = scmp.ne.s32.totalorder %s1664_s11, %s1280_s8  ;;  %s1285_s21 = scalar_lea.hbm %s1918_s3, 32 }
  0x7a   : > { %p1286_p9 = scmp.lt.u32.totalorder %s1664_s11, %s1918_s3  ;;  %p1287_p6 = scmp.lt.u32.totalorder %s1285_s21, %s1280_s8 }
  0x7b   : > { %p1283_p5 = pnand %p1281_p4, %p1586_p2  ;;  %p1289_p0 = scmp.lt.u32.totalorder %s1280_s8, %s1664_s11 }
  0x7c   : > { %p1288_p12 = por %p1287_p6, %p1286_p9 }
  0x7d   : > { %p1284_p7 = pneg %p1283_p5 }
  0x7e   : > { %p1290_p8 = por %p1289_p0, %p1288_p12 }
  0x80   : > { %p1291_p13 = pnand %p1290_p8, %p1284_p7 }
  0x82   : > { %1294 = shalt.err (!%p1291_p13)
}
  0x83   : > { %s1295_s4 = scalar_lea.vmem %s1695_s16, 16  ;;  %s1455_s13 = smov [#allocation7]  }
  0x84   : > { %p1296_p11 = scmp.ne.s32.totalorder %s1695_s16, %s1295_s4  ;;  %s1300_s10 = sshll.u32 %s1455_s13, 4  ;;  %s1301_s10 = int_to_ptr.vmem [resolvable:$false] %s1300_s10 }
  0x85   : > { %s1302_s17 = scalar_lea.vmem %s1301_s10, 32  ;;  %p1303_p4 = scmp.lt.s32.totalorder %s1695_s16, %s1301_s10 }
  0x86   : > { %p1298_p1 = pnand %p1296_p11, %p1586_p2  ;;  %p1304_p5 = scmp.lt.s32.totalorder %s1302_s17, %s1295_s4 }
  0x88   : > { %p1299_p3 = pneg %p1298_p1  ;;  %p1305_p9 = por %p1304_p5, %p1303_p4 }
  0x8a   : > { %p1306_p6 = pnand %p1305_p9, %p1299_p3 }
  0x8c   : > { %1309 = shalt.err (!%p1306_p6)
}
  0x8d   : > { %1132 = dma.hbm_to_vmem [thread:$0]  (!%p1959_p10), %s1664_s11, 16, %s1695_s16, %s1580_s12  }
  0x8e   : > { %s1310_s8 = scalar_lea.hbm %s1693_s29, 128  ;;  %s1315_s21 = scalar_lea.hbm %s1921_s6, 256 }
  0x8f   : > { %p1311_p7 = scmp.ne.s32.totalorder %s1693_s29, %s1310_s8  ;;  %p1316_p8 = scmp.lt.u32.totalorder %s1693_s29, %s1921_s6 }
  0x90   : > { %p1317_p13 = scmp.lt.u32.totalorder %s1315_s21, %s1310_s8  ;;  %p1319_p1 = scmp.lt.u32.totalorder %s1310_s8, %s1693_s29 }
  0x91   : > { %p1313_p12 = pnand %p1311_p7, %p1586_p2 }
  0x92   : > { %p1318_p11 = por %p1317_p13, %p1316_p8 }
  0x93   : > { %p1314_p0 = pneg %p1313_p12 }
  0x94   : > { %p1320_p3 = por %p1319_p1, %p1318_p11 }
  0x96   : > { %p1321_p4 = pnand %p1320_p3, %p1314_p0 }
  0x98   : > { %1324 = shalt.err (!%p1321_p4)
}
  0x99   : > { %s1325_s12 = scalar_lea.vmem %s383_s27, 128  ;;  %s1456_s11 = smov [#allocation10]  }
  0x9a   : > { %p1326_p5 = scmp.ne.s32.totalorder %s383_s27, %s1325_s12  ;;  %s1330_s16 = sshll.u32 %s1456_s11, 4  ;;  %s1331_s16 = int_to_ptr.vmem [resolvable:$false] %s1330_s16 }
  0x9b   : > { %s1332_s4 = scalar_lea.vmem %s1331_s16, 256  ;;  %p1333_p7 = scmp.lt.s32.totalorder %s383_s27, %s1331_s16 }
  0x9c   : > { %p1328_p9 = pnand %p1326_p5, %p1586_p2  ;;  %p1334_p12 = scmp.lt.s32.totalorder %s1332_s4, %s1325_s12 }
  0x9e   : > { %p1329_p6 = pneg %p1328_p9  ;;  %p1335_p10 = por %p1334_p12, %p1333_p7 }
  0xa0   : > { %p1336_p8 = pnand %p1335_p10, %p1329_p6 }
  0xa2   : > { %1339 = shalt.err (!%p1336_p8)
}
  0xa3   : > { %p1960_p13 = scmp.ne.s32.totalorder %s1952_s19, 0  ;;  %s1742_s17 = scalar_lea.hbm %s1922_s7, %s1615_s20 }
  0xa4   : > { %s393_s8 = scalar_lea.vmem [#allocation11], %s1612_s26  ;;  %s390_s30 = scalar_lea.sflag [#allocation12], %s1561_s18 }
  0xa5   : > { %1138 = dma.hbm_to_vmem [thread:$0]  (!%p1960_p13), %s1693_s29, 128, %s383_s27, %s1632_s23  }
  0xa6   : > { %s400_s25 = sshll.u32 %s393_s8, 4  ;;  %s1340_s21 = scalar_lea.hbm %s1742_s17, 128  ;;  %s401_s25 = int_to_ptr.vmem [resolvable:$true] %s400_s25 }
  0xa7   : > { %p1341_p10 = scmp.ne.s32.totalorder %s1742_s17, %s1340_s21  ;;  %s1345_s29 = scalar_lea.hbm %s1922_s7, 256 }
  0xa8   : > { %p1346_p1 = scmp.lt.u32.totalorder %s1742_s17, %s1922_s7  ;;  %p1347_p3 = scmp.lt.u32.totalorder %s1345_s29, %s1340_s21 }
  0xa9   : > { %p1343_p0 = pnand %p1341_p10, %p1586_p2  ;;  %p1349_p5 = scmp.lt.u32.totalorder %s1340_s21, %s1742_s17 }
  0xaa   : > { %p1348_p4 = por %p1347_p3, %p1346_p1 }
  0xab   : > { %p1344_p11 = pneg %p1343_p0 }
  0xac   : > { %p1350_p9 = por %p1349_p5, %p1348_p4 }
  0xae   : > { %p1351_p6 = pnand %p1350_p9, %p1344_p11 }
  0xb0   : > { %1354 = shalt.err (!%p1351_p6)
}
  0xb1   : > { %s1355_s18 = scalar_lea.vmem %s401_s25, 128  ;;  %s1457_s26 = smov [#allocation11]  }
  0xb2   : > { %p1356_p7 = scmp.ne.s32.totalorder %s401_s25, %s1355_s18  ;;  %s1360_s2 = sshll.u32 %s1457_s26, 4  ;;  %s1361_s2 = int_to_ptr.vmem [resolvable:$false] %s1360_s2 }
  0xb3   : > { %s1362_s12 = scalar_lea.vmem %s1361_s2, 256  ;;  %p1363_p10 = scmp.lt.s32.totalorder %s401_s25, %s1361_s2 }
  0xb4   : > { %p1358_p12 = pnand %p1356_p7, %p1586_p2  ;;  %p1364_p0 = scmp.lt.s32.totalorder %s1362_s12, %s1355_s18 }
  0xb6   : > { %p1359_p8 = pneg %p1358_p12  ;;  %p1365_p13 = por %p1364_p0, %p1363_p10 }
  0xb8   : > { %p1366_p1 = pnand %p1365_p13, %p1359_p8 }
  0xba   : > { %1369 = shalt.err (!%p1366_p1)
}
  0xbb   : > { %p1961_p3 = scmp.ne.s32.totalorder %s1952_s19, 0  ;;  %p1962_p11 = scmp.ne.s32.totalorder %s1956_s22, 0 }
  0xbc   : > { %s1766_s14 = sand.u32 (!%p1962_p11), 1, %s1440_s28   ;;  %p1963_p2 = scmp.ne.s32.totalorder (!%p1962_p11), %s1947_s15, 0 }
  0xbd   : > { %1141 = dma.hbm_to_vmem [thread:$0]  (!%p1961_p3), %s1742_s17, 128, %s401_s25, %s390_s30  }
  0xbe   : > { %409 = sbr.rel (%p1962_p11) target bundleno = 759 (0x2f7), region = 52  ;;  %s412_s11 = scalar_lea.sflag (!%p1962_p11), [#allocation3], %s1766_s14 }
  0xbf   : > { %s414_s16 = scalar_lea.vmem (!%p1962_p11), [#allocation2], %s1766_s14 }
  0xc5   : > { %1415 = dma.done.wait (%p1963_p2), %s412_s11, 16  }
  0xc6   : > { %1417 = vsyncadd (%p1963_p2), %s412_s11, 4294967280  ;;  %s419_s19 = sand.u32 1, %s1527_s9   ;;  %s1087_s4 = sshll.u32 %s1766_s14, 4 }
  0xc7   : > { %s420_s22 = scalar_lea.sflag [#allocation6], %s419_s19  ;;  %s423_s13 = scalar_lea.vmem [#allocation5], %s1087_s4 }
  0xc8   : > { %1419 = dma.done.wait (%p1963_p2), %s420_s22, 272  }
  0xc9   : > { %1421 = vsyncadd (%p1963_p2), %s420_s22, 4294967024  ;;  %s1781_s10 = sshll.u32 %s1766_s14, 3  ;;  %s431_s17 = scalar_lea.vmem [#allocation7], %s1766_s14 }
  0xca   : > { %s437_s8 = scalar_lea.sflag [#allocation9], %s419_s19  ;;  %s440_s25 = scalar_lea.vmem [#allocation8], %s1781_s10 }
  0xcb   : > { %1423 = dma.done.wait (%p1963_p2), %s437_s8, 256  }
  0xcc   : > { %1425 = vsyncadd (%p1963_p2), %s437_s8, 4294967040  ;;  %s449_s30 = scalar_lea.vmem [#allocation10], %s1781_s10  ;;  %s455_s21 = scalar_lea.sflag [#allocation12], %s1766_s14 }
  0xcd   : > { %s458_s24 = scalar_lea.vmem [#allocation11], %s1781_s10 }
  0xce   : > { %1427 = dma.done.wait (%p1963_p2), %s455_s21, 128  }
  0xcf   : > { %1429 = vsyncadd (%p1963_p2), %s455_s21, 4294967168  ;;  %p520_p13 = scmp.lt.s32.totalorder %s1527_s9, 1  ;;  %vm529_vm0 = vcmask 261120   ;;  %v527_v0 = vld [vmem:[%s423_s13] sm:$0xff]  ;;  %v528_v1 = vld [vmem:[%s423_s13 + $0x8] sm:$0xff]  ;;  %v1458_v5 = vmov 0   ;;  %v566_v12 = vlaneseq }
  0xd0   : > { %v530_v3 = vsel %vm529_vm0, %v527_v0, 0.0  ;;  %v533_v4 = vsel %vm529_vm0, %v528_v1, 0.0  ;;  %1184 = vset.pattern.permute.xlu0 %v1458_v5  ;;  %1185 = vset.pattern.permute.xlu1 %v1458_v5  ;;  %v1459_v10 = vmov 1966171168   ;;  %vm806_vm1 = vcmask 253952   ;;  %s1964_s22 = sld [smem:[#allocation24_spill]] }
  0xd1   : > { %s1798_s23 = scalar_select %p520_p13, %s1527_s9, 1  ;;  %531 = vadd.xlane.f32.xlu0 %v530_v3  ;;  %v564_v11 = vunpack.c.l.s4 %v1459_v10  ;;  %v1807_v14 = vshrl.u32 %v566_v12, 7  ;;  %vm775_vm2 = vcmask 130112   ;;  %vm794_vm3 = vcmask 122880  }
  0xd2   : > { %s1097_s13 = sshll.u32 %s1527_s9, 4  ;;  %s519_s10 = scalar_lea.vmem [#allocation13], %s1766_s14 }
  0xd3   : > { %s522_s20 = scalar_lea.vmem %s1916_s1, %s1798_s23  ;;  %v565_v13 = vunpack.c.0.s8 %v564_v11  ;;  %s1091_s15 = sshll.u32 %s1798_s23, 3  ;;  %v1846_v11 = vand.u32 127, %v566_v12 }
  0xd4   : > { %v1092_v2 = vld [vmem:[%s522_s20] ss:$0 sm:$0xff]  ;;  %s526_s2 = scalar_lea.vmem %s1920_s5, %s1091_s15  ;;  %s870_s23 = scalar_lea.sflag [#allocation4], %s1766_s14 }
  0xd5   : > { %549 = vbcast.lane.b32.xlu1 %v1092_v2, 256  ;;  %534 = vadd.xlane.f32.xlu0 %v533_v4  ;;  %v1810_v17 = vsub.s32 %v565_v13, %v1807_v14  ;;  %v817_v4 = vld [vmem:[%s440_s25] sm:$0xff]  ;;  %v770_v13 = vadd.s32 4294967288, %v1846_v11  ;;  %vm853_vm4 = vcmp.eq.s32.totalorder %v1846_v11, 0  ;;  %vm856_vm5 = vcmp.eq.s32.totalorder %v1846_v11, 1  ;;  %s1460_s9 = smov [#allocation13]  }
  0xd6   : > { %v818_v5 = vld [vmem:[%s526_s2] sm:$0xff]  ;;  %vm860_vm6 = vcmp.eq.s32.totalorder %v1846_v11, 2  ;;  %vm864_vm7 = vcmp.eq.s32.totalorder %v1846_v11, 3  ;;  %p1967_p5 = scmp.ne.s32.totalorder %s1964_s22, 0  ;;  %s1374_s27 = sshll.u32 %s1460_s9, 4  ;;  %s1375_s27 = int_to_ptr.vmem [resolvable:$false] %s1374_s27 }
  0xd7   : > { %s1376_s20 = scalar_lea.vmem %s1375_s27, 32 }
  0xd9   : > { %553 = vbcast.lane.b32.xlu1 %v1092_v2, 264 }
 0x147   : > { %v550_v15 = vpop.permute.xlu1 %549 }
 0x14b   : > { %v554_v21 = vpop.permute.xlu1 %553 }
 0x15e   : > { %v532_v6 = vpop.xlane.xlu0 %531 }
 0x15f   : > { %v536_v7 = vadd.f32 1e-08, %v532_v6  ;;  %v819_v6 = vadd.f32 %v818_v5, %v817_v4 }
 0x161   : > { %1186 = vlog2.f32 %v536_v7  ;;  %v820_v7 = vmul.f32 %v819_v6, %v819_v6 }
 0x162   : > { %v535_v8 = vpop.xlane.xlu0 %534 }
 0x163   : > { %v537_v9 = vadd.f32 1e-08, %v535_v8  ;;  %v821_v8 = vsel %vm529_vm0, %v820_v7, 0.0 }
 0x165   : > { %1188 = vlog2.f32 %v537_v9  ;;  %v805_v9 = vld [vmem:[%s431_s17] sm:$0x1]  ;;  %s882_s17 = sshll.u32 %s519_s10, 4  ;;  %s1873_s17 = int_to_ptr.vmem [resolvable:$true] %s882_s17 }
 0x166   : > { %v807_v10 = vsel %vm806_vm1, %v805_v9, 0.0  ;;  %s1370_s29 = scalar_lea.vmem %s1873_s17, 16  ;;  %p1377_p7 = scmp.lt.s32.totalorder %s1873_s17, %s1375_s27 }
 0x167   : > { %p1371_p4 = scmp.ne.s32.totalorder %s1873_s17, %s1370_s29  ;;  %p1378_p12 = scmp.lt.s32.totalorder %s1376_s20, %s1370_s29 }
 0x169   : > { %p1372_p9 = pnand %p1371_p4, %p1967_p5  ;;  %p1379_p8 = por %p1378_p12, %p1377_p7 }
 0x16b   : > { %v1187_v16 = vpop.eup %1186  ;;  %p1373_p6 = pneg %p1372_p9 }
 0x16c   : > { %v539_v18 = vmul.f32 0.6931472, %v1187_v16  ;;  %v773_v16 = vsub.s32 %v770_v13, %v1807_v14 }
 0x16d   : > { %p1380_p10 = pnand %p1379_p8, %p1373_p6 }
 0x16e   : > { %v557_v19 = vmul.f32 %v550_v15, %v539_v18  ;;  %v768_v15 = vsub.s32 %v1846_v11, %v1807_v14 }
 0x16f   : > { %v1189_v20 = vpop.eup %1188 }
 0x170   : > { %v562_v22 = vcombine.high %v557_v19, %v557_v19  ;;  %v569_v23 = vrot.slane %v557_v19, %v1810_v17  ;;  %v541_v24 = vmul.f32 0.6931472, %v1189_v20  ;;  %v831_v19 = vld [vmem:[%s449_s30] sm:$0xff]  ;;  %v832_v20 = vld [vmem:[%s458_s24] sm:$0xff]  ;;  %s1965_s30 = sld [smem:[#allocation28_spill]] }
 0x171   : > { %v833_v12 = vsub.f32 %v831_v19, %v832_v20 }
 0x172   : > { %v576_v25 = vrot.slane %v562_v22, %v1810_v17  ;;  %v577_v26 = vcombine.high %v569_v23, %v569_v23  ;;  %v558_v27 = vmul.f32 %v554_v21, %v541_v24  ;;  %v585_v29 = vrot.slane %v569_v23, %v1810_v17 }
 0x173   : > { %v838_v24 = vsub.s32 0, %v1807_v14 }
 0x174   : > { %v578_v28 = vcombine.high %v576_v25, %v576_v25  ;;  %v599_v30 = vrot.slane %v577_v26, %v1810_v17  ;;  %v611_v31 = vcombine.high %v558_v27, %v558_v27  ;;  %v592_v32 = vrot.slane %v576_v25, %v1810_v17 }
 0x175   : > { %v618_v33 = vrot.slane %v558_v27, %v1810_v17  ;;  %v559_v27 = vld [vmem:[%s414_s16] sm:$0x1] }
 0x176   : > { %v606_v34 = vrot.slane %v578_v28, %v1810_v17  ;;  %v660_v35 = vcombine.low %v585_v29, %v599_v30  ;;  %v1093_v36 = vcombine.high %v585_v29, %v599_v30  ;;  %v625_v37 = vrot.slane %v611_v31, %v1810_v17  ;;  %s1966_s21 = smov %s1965_s30  ;;  %s1871_s24 = scalar_lea.hbm %s1965_s30, %s1097_s13 }
 0x177   : > { %v626_v38 = vcombine.high %v618_v33, %v618_v33  ;;  %v634_v44 = vrot.slane %v618_v33, %v1810_v17  ;;  %v839_v28 = vrot.slane %v805_v9, %v838_v24  ;;  %v834_v30 = vmul.f32 %v833_v12, %v833_v12 }
 0x178   : > { %v662_v39 = vcombine.low %v592_v32, %v606_v34  ;;  %v1094_v40 = vcombine.high %v592_v32, %v606_v34  ;;  %v670_v41 = vrot.slane %v660_v35, %v1810_v17  ;;  %v677_v42 = vrot.slane %v1093_v36, %v1810_v17 }
 0x179   : > { %v627_v43 = vcombine.high %v625_v37, %v625_v37  ;;  %v648_v45 = vrot.slane %v626_v38, %v1810_v17  ;;  %v641_v49 = vrot.slane %v625_v37, %v1810_v17  ;;  %v841_v33 = vmul.f32 %v839_v28, %v834_v30 }
 0x17a   : > { %v684_v46 = vrot.slane %v662_v39, %v1810_v17  ;;  %v691_v47 = vrot.slane %v1094_v40, %v1810_v17  ;;  %v692_v48 = vcombine.low %v670_v41, %v677_v42 }
 0x17b   : > { %v655_v50 = vrot.slane %v627_v43, %v1810_v17  ;;  %v709_v51 = vcombine.low %v634_v44, %v648_v45  ;;  %v1095_v52 = vcombine.high %v634_v44, %v648_v45  ;;  %v842_v35 = vsel %vm529_vm0, %v841_v33, 0.0 }
 0x17c   : > { %v693_v53 = vcombine.low %v684_v46, %v691_v47  ;;  %v700_v58 = vrot.slane %v692_v48, %v1810_v17 }
 0x17d   : > { %v711_v54 = vcombine.low %v641_v49, %v655_v50  ;;  %v1096_v55 = vcombine.high %v641_v49, %v655_v50  ;;  %v719_v56 = vrot.slane %v709_v51, %v1810_v17  ;;  %v726_v57 = vrot.slane %v1095_v52, %v1810_v17 }
 0x17e   : > { %v707_v59 = vrot.slane %v693_v53, %v1810_v17 }
 0x17f   : > { %v733_v60 = vrot.slane %v711_v54, %v1810_v17  ;;  %v740_v61 = vrot.slane %v1096_v55, %v1810_v17  ;;  %v741_v62 = vcombine.low %v719_v56, %v726_v57 }
 0x180   : > { %v708_v63 = vcombine.low %v700_v58, %v707_v59 }
 0x181   : > { %v742_v0 = vcombine.low %v733_v60, %v740_v61  ;;  %v749_v1 = vrot.slane %v741_v62, %v1810_v17 }
 0x182   : > { %759 = vperm.xlu0 %1184, %v708_v63  }
 0x183   : > { %v756_v2 = vrot.slane %v742_v0, %v1810_v17 }
 0x185   : > { %v757_v3 = vcombine.low %v749_v1, %v756_v2 }
 0x187   : > { %762 = vperm.xlu1 %1185, %v757_v3  }
 0x1a1   : > { %822 = vadd.xlane.f32.xlu0 %v821_v8 }
 0x1ab   : > { %808 = vadd.xlane.f32.xlu1 %v807_v10 }
 0x201   : > { %v760_v18 = vpop.permute.xlu0 %759 }
 0x202   : > { %v769_v22 = vrot.slane %v760_v18, %v768_v15 }
 0x206   : > { %v763_v21 = vpop.permute.xlu1 %762 }
 0x207   : > { %v774_v23 = vrot.slane %v763_v21, %v773_v16 }
 0x209   : > { %v776_v25 = vsel %vm775_vm2, %v774_v23, %v769_v22 }
 0x20a   : > { %v783_v26 = vrot.slane %v776_v25, %v1810_v17 }
 0x20c   : > { %v790_v29 = vrot.slane %v783_v26, %v1810_v17 }
 0x20e   : > { %v792_v31 = vsub.f32 %v559_v27, %v790_v29 }
 0x210   : > { %v793_v32 = vmul.f32 %v792_v31, %v792_v31 }
 0x212   : > { %v795_v34 = vsel %vm794_vm3, %v793_v32, 0.0 }
 0x213   : > { %796 = vadd.xlane.f32.xlu1 %v795_v34 }
 0x217   : > { %843 = vadd.xlane.f32.xlu1 %v842_v35 }
 0x22e   : > { %v823_v36 = vpop.xlane.xlu0 %822 }
 0x22f   : > { %v824_v38 = vrot.slane %v823_v36, 4 }
 0x231   : > { %v825_v40 = vadd.f32 %v824_v38, %v823_v36 }
 0x233   : > { %v826_v43 = vrot.slane %v825_v40, 2 }
 0x235   : > { %v827_v47 = vadd.f32 %v826_v43, %v825_v40 }
 0x237   : > { %v828_v55 = vrot.slane %v827_v47, 1 }
 0x238   : > { %v809_v14 = vpop.xlane.xlu1 %808 }
 0x239   : > { %v810_v37 = vrot.slane %v809_v14, 4  ;;  %v829_v59 = vadd.f32 %v828_v55, %v827_v47 }
 0x23b   : > { %v811_v39 = vadd.f32 %v810_v37, %v809_v14 }
 0x23d   : > { %v812_v41 = vrot.slane %v811_v39, 2 }
 0x23f   : > { %v813_v46 = vadd.f32 %v812_v41, %v811_v39 }
 0x241   : > { %v814_v52 = vrot.slane %v813_v46, 1 }
 0x243   : > { %v815_v58 = vadd.f32 %v814_v52, %v813_v46 }
 0x2a0   : > { %v797_v42 = vpop.xlane.xlu1 %796 }
 0x2a1   : > { %v798_v17 = vrot.slane %v797_v42, 4 }
 0x2a3   : > { %v799_v44 = vadd.f32 %v798_v17, %v797_v42 }
 0x2a4   : > { %v844_v45 = vpop.xlane.xlu1 %843 }
 0x2a5   : > { %v800_v48 = vrot.slane %v799_v44, 2  ;;  %v845_v49 = vrot.slane %v844_v45, 4 }
 0x2a7   : > { %v846_v50 = vadd.f32 %v845_v49, %v844_v45  ;;  %v801_v51 = vadd.f32 %v800_v48, %v799_v44 }
 0x2a9   : > { %v847_v53 = vrot.slane %v846_v50, 2  ;;  %v802_v54 = vrot.slane %v801_v51, 1 }
 0x2ab   : > { %v848_v56 = vadd.f32 %v847_v53, %v846_v50  ;;  %v803_v57 = vadd.f32 %v802_v54, %v801_v51 }
 0x2ad   : > { %1101 = vpush %v803_v57  ;;  %v849_v60 = vrot.slane %v848_v56, 1 }
 0x2ae   : > { %1103 = vpush %v815_v58 }
 0x2af   : > { %1105 = vpush %v829_v59  ;;  %v850_v61 = vadd.f32 %v849_v60, %v848_v56 }
 0x2b1   : > { %1107 = vpush %v850_v61 }
 0x2de   : > { %s1102_s12 = spop %1101 }
 0x2df   : > { %v854_v62 = vstv %s1102_s12  ;;  %s1104_s11 = spop %1103 }
 0x2e0   : > { %v855_v63 = vsel %vm853_vm4, %v854_v62, 0.0  ;;  %v857_v0 = vstv %s1104_s11  ;;  %s1106_s16 = spop %1105 }
 0x2e1   : > { %v858_v1 = vsel %vm856_vm5, %v857_v0, 0.0  ;;  %v861_v2 = vstv %s1106_s16 }
 0x2e2   : > { %v859_v3 = vadd.f32 %v858_v1, %v855_v63  ;;  %s1108_s19 = spop %1107  ;;  %v862_v4 = vsel %vm860_vm6, %v861_v2, 0.0 }
 0x2e3   : > { %s852_s4 = smul.f32 0.5, %s1108_s19 }
 0x2e4   : > { %v863_v5 = vadd.f32 %v862_v4, %v859_v3 }
 0x2e5   : > { %v865_v6 = vstv %s852_s4 }
 0x2e6   : > { %v866_v7 = vsel %vm864_vm7, %v865_v6, 0.0 }
 0x2e7   : > { %v867_v8 = vadd.f32 %v866_v7, %v863_v5 }
 0x2e9   : > { %868 = vst [vmem:[%s519_s10] sm:$0x1] %v867_v8 }
 0x2ea   : > { %1383 = shalt.err (!%p1380_p10)
}
 0x2eb   : > { %s1384_s14 = scalar_lea.hbm %s1871_s24, 16  ;;  %s1388_s26 = scalar_lea.hbm %s1966_s21, 32 }
 0x2ec   : > { %p1385_p0 = scmp.ne.s32.totalorder %s1871_s24, %s1384_s14  ;;  %p1389_p11 = scmp.lt.u32.totalorder %s1871_s24, %s1966_s21 }
 0x2ed   : > { %p1390_p2 = scmp.lt.u32.totalorder %s1388_s26, %s1384_s14  ;;  %p1392_p4 = scmp.lt.u32.totalorder %s1384_s14, %s1871_s24 }
 0x2ee   : > { %p1386_p1 = pnand %p1385_p0, %p1967_p5 }
 0x2ef   : > { %p1391_p13 = por %p1390_p2, %p1389_p11 }
 0x2f0   : > { %p1387_p3 = pneg %p1386_p1 }
 0x2f1   : > { %p1393_p9 = por %p1392_p4, %p1391_p13 }
 0x2f3   : > { %p1394_p6 = pnand %p1393_p9, %p1387_p3 }
 0x2f5   : > { %1397 = shalt.err (!%p1394_p6)
}
 0x2f6   : > { %1121 = dma.vmem_to_hbm [thread:$0]  (%p1967_p5), %s1873_s17, 16, %s1871_s24, %s870_s23  }
 0x2f7 PF: > { %s1968_s11 = sld [smem:[#allocation19_spill]]  ;;  %s1969_s16 = sld [smem:[#allocation25_spill]] }
 0x2f8   : > { %s1970_s19 = sld [smem:[#allocation21_spill]] }
 0x2fd   : > { %s894_s4 = sand.u32 1, %s1968_s11   ;;  %p1971_p7 = scmp.ne.s32.totalorder %s1969_s16, 0 }
 0x2fe   : > { %p1972_p12 = scmp.ge.s32.totalorder %s1970_s19, 2  ;;  %s895_s13 = scalar_lea.sflag [#allocation4], %s894_s4 }
 0x300   : > { %p1143_p8 = pnand %p1972_p12, %p1971_p7 }
 0x302   : > { %1431 = dma.done.wait (!%p1143_p8), %s895_s13, 16  }
 0x303   : > { %1433 = vsyncadd (!%p1143_p8), %s895_s13, 4294967280  ;;  %s1973_s30 = sld [smem:[#allocation22_spill]]  ;;  %s1974_s10 = sld [smem:[#allocation20_spill]] }
 0x304   : > { %s1975_s29 = sld [smem:[#allocation23_spill]]  ;;  %s1976_s27 = smov %s1440_s28 }
 0x309   : > { %p30_p10 = scmp.ge.s32.totalorder %s1973_s30, 4   ;;  %s1977_s28 = smov %s1974_s10 }
 0x30b   :  { %32 = sbr.rel (!%p30_p10) target bundleno = 15 (0xf), region = 164 }
 0x312   :  { %899 = vsyncpa [#allocation3], 1 }
 0x313   :  { %901 = vsyncpa [#allocation3 + $0x1], 1 }
 0x314   :  { %902 = vsyncpa [#allocation6], 1 }
 0x315   :  { %904 = vsyncpa [#allocation6 + $0x1], 1 }
 0x316   :  { %905 = vsyncpa [#allocation9], 1 }
 0x317   :  { %907 = vsyncpa [#allocation9 + $0x1], 1 }
 0x318   :  { %908 = vsyncpa [#allocation12], 1 }
 0x319   :  { %910 = vsyncpa [#allocation12 + $0x1], 1 }
 0x31a   :  { %911 = vsyncpa [#allocation4], 1 }
 0x31b   :  { %913 = vsyncpa [#allocation4 + $0x1], 1 }

</bundles_post_ra>
